<compile_context>
chip_gen: v6e
topology: v6e:2x2x1
jax: 0.10.0
libtpu: 0.0.40
codegen_flags: <defaults>
</compile_context>

<pallas_src>
import jax
import jax.numpy as jnp
from jax.experimental import pallas as pl
from jax.experimental.pallas import tpu as pltpu


def _round_up(x, m):
    return ((x + m - 1) // m) * m


# ---------------------------------------------------------------------------
# Kernels
# ---------------------------------------------------------------------------
def ffn_kernel_f32_out(x_ref, w1_ref, b1_ref, w2_ref, b2_ref, o_ref):
    """FFN step accumulating directly into the f32, VMEM-resident output tile."""
    k = pl.program_id(1)

    @pl.when(k == 0)
    def _():
        # Initialize with the output bias (broadcast over rows).
        o_ref[...] = jnp.zeros_like(o_ref) + b2_ref[...]

    # First matmul for this d_ff chunk: (tm, d_model) x (d_model, tk) -> f32.
    h = jnp.dot(x_ref[...], w1_ref[0], preferred_element_type=jnp.float32)
    # Fused bias + ReLU in f32 (VPU), then bf16 for the second MXU pass.
    h = jnp.maximum(h + b1_ref[...], 0.0)
    # Second matmul accumulate: (tm, tk) x (tk, d_model) into the output tile.
    o_ref[...] += jnp.dot(h.astype(w2_ref.dtype), w2_ref[...],
                          preferred_element_type=jnp.float32)


def ffn_kernel_acc(x_ref, w1_ref, b1_ref, w2_ref, b2_ref, o_ref, acc_ref):
    """FFN step with an f32 scratch accumulator (for non-f32 output dtypes)."""
    k = pl.program_id(1)

    @pl.when(k == 0)
    def _():
        acc_ref[...] = jnp.zeros_like(acc_ref) + b2_ref[...]

    h = jnp.dot(x_ref[...], w1_ref[0], preferred_element_type=jnp.float32)
    h = jnp.maximum(h + b1_ref[...], 0.0)
    acc_ref[...] += jnp.dot(h.astype(w2_ref.dtype), w2_ref[...],
                            preferred_element_type=jnp.float32)

    @pl.when(k == pl.num_programs(1) - 1)
    def _():
        o_ref[...] = acc_ref[...].astype(o_ref.dtype)


# ---------------------------------------------------------------------------
# VMEM-aware tile selection
# ---------------------------------------------------------------------------
def _vmem_footprint(tm, tk, d_model_p, out_bytes, use_scratch):
    """Approximate per-call VMEM bytes for a (tm, tk) tiling."""
    tn = d_model_p
    x_tile = 2 * tm * d_model_p * 2          # bf16 x tile, double-buffered
    w1_tile = 2 * d_model_p * tk * 2         # bf16 W1 chunk, double-buffered
    w2_tile = 2 * tk * tn * 2                # bf16 W2 chunk, double-buffered
    bias = 2 * (tk + tn) * 4                 # f32 biases, double-buffered
    out_tile = 2 * tm * tn * out_bytes       # output tile
    acc = tm * tn * 4 if use_scratch else 0  # f32 accumulator scratch
    h_tmp = tm * tk * 6                      # hidden act: f32 + bf16 copy
    return x_tile + w1_tile + w2_tile + bias + out_tile + acc + h_tmp


def _pick_tiles(M, d_model_p, d_ff, out_bytes, budget, use_scratch):
    """Largest row tile first (flops/weight-byte == tm), then largest tk."""
    if M < 128:
        tm_cands = [_round_up(max(M, 8), 8)]
    else:
        tm_max = _round_up(M, 128)
        tm_cands = [c for c in (1024, 768, 512, 384, 256, 128) if c <= tm_max]
        if not tm_cands:
            tm_cands = [tm_max]

    tk_max = _round_up(d_ff, 128)
    tk_cands = [c for c in (512, 256, 128) if c <= tk_max] or [tk_max]

    for tm_c in tm_cands:
        for tk_c in tk_cands:
            if _vmem_footprint(tm_c, tk_c, d_model_p, out_bytes,
                               use_scratch) <= budget:
                return tm_c, tk_c
    return tm_cands[-1], tk_cands[-1]


# ---------------------------------------------------------------------------
# Wrapper
# ---------------------------------------------------------------------------
def feed_forward(x, w1, b1, w2, b2, *, tm=None, tk_ff=None):
    """x: [batch, seq, d_model]; w1: [d_model, d_ff]; b1: [d_ff];
       w2: [d_ff, d_model]; b2: [d_model].  Returns [batch, seq, d_model]."""
    batch, seq, d_model = x.shape
    d_ff = w1.shape[1]
    M = batch * seq
    out_dtype = x.dtype
    out_bytes = jnp.dtype(out_dtype).itemsize
    f32_out = jnp.dtype(out_dtype) == jnp.dtype(jnp.float32)

    # ---- Generation-aware VMEM budget (v7x: 64 MiB/TC, v5e/v6e: 128 MiB) ----
    try:
        vmem_cap = int(pltpu.get_tpu_info().vmem_capacity_bytes)
    except Exception:
        vmem_cap = 64 * 1024 * 1024          # conservative fallback
    vmem_limit = int(min(vmem_cap - 8 * 1024 * 1024, int(vmem_cap * 0.85)))
    tile_budget = vmem_limit - 6 * 1024 * 1024   # slack for internal scratch

    d_model_p = _round_up(d_model, 128)          # lane-dense output columns

    tm_auto, tk_auto = _pick_tiles(M, d_model_p, d_ff, out_bytes,
                                   tile_budget, not f32_out)
    tm_eff = tm_auto if tm is None else max(
        8, _round_up(min(tm, _round_up(M, 8)), 8))
    tk_eff = tk_auto if tk_ff is None else max(
        128, _round_up(min(tk_ff, _round_up(d_ff, 128)), 128))

    d_ff_p = _round_up(d_ff, tk_eff)
    M_p = _round_up(M, tm_eff)
    n_i = M_p // tm_eff
    n_k = d_ff_p // tk_eff

    # ---- Zero-pad to the tiled shapes (zeros are exact no-ops for the FFN) ----
    x2 = jnp.pad(x.reshape(M, d_model),
                 ((0, M_p - M), (0, d_model_p - d_model))).astype(jnp.bfloat16)
    w1p = jnp.pad(w1, ((0, d_model_p - d_model),
                       (0, d_ff_p - d_ff))).astype(jnp.bfloat16)
    # Pre-tile W1 so each streamed (d_model_p, tk) chunk is a contiguous slab.
    w1t = w1p.reshape(d_model_p, n_k, tk_eff).transpose(1, 0, 2)
    w2p = jnp.pad(w2, ((0, d_ff_p - d_ff),
                       (0, d_model_p - d_model))).astype(jnp.bfloat16)
    b1p = jnp.pad(b1, (0, d_ff_p - d_ff)).reshape(1, d_ff_p).astype(jnp.float32)
    b2p = jnp.pad(b2, (0, d_model_p - d_model)).reshape(1, d_model_p).astype(
        jnp.float32)

    grid = (n_i, n_k)

    in_specs = [
        pl.BlockSpec((tm_eff, d_model_p), lambda i, k: (i, 0)),      # x rows
        pl.BlockSpec((1, d_model_p, tk_eff), lambda i, k: (k, 0, 0)),  # W1 chunk
        pl.BlockSpec((1, tk_eff), lambda i, k: (0, k)),              # b1 chunk
        pl.BlockSpec((tk_eff, d_model_p), lambda i, k: (k, 0)),      # W2 chunk
        pl.BlockSpec((1, d_model_p), lambda i, k: (0, 0)),           # b2
    ]
    out_spec = pl.BlockSpec((tm_eff, d_model_p), lambda i, k: (i, 0))

    if f32_out:
        kernel = ffn_kernel_f32_out
        scratch_shapes = []
    else:
        kernel = ffn_kernel_acc
        scratch_shapes = [pltpu.VMEM((tm_eff, d_model_p), jnp.float32)]

    # Weights are re-streamed once per row tile (n_i times).
    cost = pl.CostEstimate(
        flops=4 * M_p * d_model_p * d_ff_p,          # two matmuls
        transcendentals=0,
        bytes_accessed=(M_p * d_model_p * 2                      # x (bf16)
                        + n_i * 2 * d_model_p * d_ff_p * 2       # W1 + W2 (bf16)
                        + n_i * (d_ff_p + d_model_p) * 4         # biases (f32)
                        + M_p * d_model_p * out_bytes),          # output
    )

    out = pl.pallas_call(
        kernel,
        out_shape=jax.ShapeDtypeStruct((M_p, d_model_p), out_dtype),
        grid_spec=pltpu.PrefetchScalarGridSpec(
            num_scalar_prefetch=0,
            grid=grid,
            in_specs=in_specs,
            out_specs=out_spec,
            scratch_shapes=scratch_shapes,
        ),
        compiler_params=pltpu.CompilerParams(
            dimension_semantics=("parallel", "arbitrary"),
            vmem_limit_bytes=vmem_limit,
        ),
        cost_estimate=cost,
    )(x2, w1t, b1p, w2p, b2p)

    return out[:M, :d_model].reshape(batch, seq, d_model)


if __name__ == "__main__":
    # Small, deterministic example shapes.
    batch, seq, d_model, d_ff = 2, 8, 32, 64
    key = jax.random.PRNGKey(0)
    kx, kw1, kb1, kw2, kb2 = jax.random.split(key, 5)

    x = jax.random.normal(kx, (batch, seq, d_model), dtype=jnp.float32)
    # Deterministic parameter init (analogous to nn.Linear's uniform init scale).
    w1 = jax.random.uniform(kw1, (d_model, d_ff), jnp.float32,
                            -1.0 / d_model ** 0.5, 1.0 / d_model ** 0.5)
    b1 = jax.random.uniform(kb1, (d_ff,), jnp.float32,
                            -1.0 / d_model ** 0.5, 1.0 / d_model ** 0.5)
    w2 = jax.random.uniform(kw2, (d_ff, d_model), jnp.float32,
                            -1.0 / d_ff ** 0.5, 1.0 / d_ff ** 0.5)
    b2 = jax.random.uniform(kb2, (d_ff // d_ff * d_model,), jnp.float32,
                            -1.0 / d_ff ** 0.5, 1.0 / d_ff ** 0.5)

    ffn = jax.jit(feed_forward)
    y = jax.block_until_ready(ffn(x, w1, b1, w2, b2))

    # Pure-JAX f32 reference (eval-mode FFN). Loose tolerance: kernel uses bf16
    # MXU operands with f32 accumulation.
    ref = jnp.maximum(x.reshape(-1, d_model) @ w1 + b1, 0.0) @ w2 + b2
    ref = ref.reshape(batch, seq, d_model)
    assert y.shape == ref.shape
    assert jnp.allclose(y, ref, atol=2e-2, rtol=2e-2), "mismatch vs reference"

    print("KERNEL_OK")
</pallas_src>

<mosaic_0001>
module attributes {stable_mosaic.version = 11 : i64} {
  func.func @ffn_kernel_f32_out(%arg0: i32, %arg1: i32, %arg2: memref<16x128xbf16, #tpu.memory_space<vmem>>, %arg3: memref<1x128x128xbf16, #tpu.memory_space<vmem>>, %arg4: memref<1x128xf32, #tpu.memory_space<vmem>>, %arg5: memref<128x128xbf16, #tpu.memory_space<vmem>>, %arg6: memref<1x128xf32, #tpu.memory_space<vmem>>, %arg7: memref<16x128xf32, #tpu.memory_space<vmem>>) attributes {dimension_semantics = [#tpu.dimension_semantics<parallel>, #tpu.dimension_semantics<arbitrary>], iteration_bounds = array<i64: 1, 1>, scalar_prefetch = 0 : i64, scratch_operands = 0 : i64, tpu.core_type = #tpu.core_type<tc>, window_params = [{transform_indices = @transform_0, window_bounds = array<i64: 16, 128>}, {transform_indices = @transform_1, window_bounds = array<i64: 1, 128, 128>}, {transform_indices = @transform_2, window_bounds = array<i64: 1, 128>}, {transform_indices = @transform_3, window_bounds = array<i64: 128, 128>}, {pipeline_mode = #tpu.pipeline_mode<synchronous>, transform_indices = @transform_4, window_bounds = array<i64: 1, 128>}, {transform_indices = @transform_5, window_bounds = array<i64: 16, 128>}]} {
    %c0_i32 = arith.constant 0 : i32
    %0 = arith.cmpi eq, %arg1, %c0_i32 : i32
    %1 = arith.extui %0 : i1 to i32
    %c0_i32_0 = arith.constant 0 : i32
    %2 = arith.cmpi ne, %1, %c0_i32_0 : i32
    scf.if %2 {
      %cst_15 = arith.constant 0.000000e+00 : f32
      %18 = vector.broadcast %cst_15 : f32 to vector<16x128xf32>
      %c0_16 = arith.constant 0 : index
      %c0_17 = arith.constant 0 : index
      %19 = vector.load %arg6[%c0_16, %c0_17] : memref<1x128xf32, #tpu.memory_space<vmem>>, vector<1x128xf32>
      %20 = vector.broadcast %19 : vector<1x128xf32> to vector<16x128xf32>
      %21 = arith.addf %18, %20 : vector<16x128xf32>
      %c0_18 = arith.constant 0 : index
      %c0_19 = arith.constant 0 : index
      %22 = vector.load %arg7[%c0_18, %c0_19] : memref<16x128xf32, #tpu.memory_space<vmem>>, vector<16x128xf32>
      tpu.vector_store %arg7[%c0_18, %c0_19], %21 {strides = array<i32>} : memref<16x128xf32, #tpu.memory_space<vmem>>, vector<16x128xf32>,
    } else {
    }
    %c0 = arith.constant 0 : index
    %c0_1 = arith.constant 0 : index
    %3 = vector.load %arg2[%c0, %c0_1] : memref<16x128xbf16, #tpu.memory_space<vmem>>, vector<16x128xbf16>
    %c0_2 = arith.constant 0 : index
    %c0_3 = arith.constant 0 : index
    %c0_4 = arith.constant 0 : index
    %4 = vector.load %arg3[%c0_2, %c0_3, %c0_4] : memref<1x128x128xbf16, #tpu.memory_space<vmem>>, vector<1x128x128xbf16>
    %5 = vector.shape_cast %4 : vector<1x128x128xbf16> to vector<128x128xbf16>
    %cst = arith.constant dense<0.000000e+00> : vector<16x128xf32>
    %6 = tpu.matmul %3, %5, %cst {dimension_numbers = #tpu.dot_dimension_numbers<[1], [0], [0], [1], [0, 0, 1, 1], [], []>} : vector<16x128xbf16>, vector<128x128xbf16>, vector<16x128xf32> -> vector<16x128xf32>
    %c0_5 = arith.constant 0 : index
    %c0_6 = arith.constant 0 : index
    %7 = vector.load %arg4[%c0_5, %c0_6] : memref<1x128xf32, #tpu.memory_space<vmem>>, vector<1x128xf32>
    %8 = vector.broadcast %7 : vector<1x128xf32> to vector<16x128xf32>
    %9 = arith.addf %6, %8 : vector<16x128xf32>
    %cst_7 = arith.constant 0.000000e+00 : f32
    %10 = vector.broadcast %cst_7 : f32 to vector<16x128xf32>
    %11 = arith.maximumf %9, %10 : vector<16x128xf32>
    %c0_8 = arith.constant 0 : index
    %c0_9 = arith.constant 0 : index
    %12 = vector.load %arg7[%c0_8, %c0_9] : memref<16x128xf32, #tpu.memory_space<vmem>>, vector<16x128xf32>
    %13 = arith.truncf %11 : vector<16x128xf32> to vector<16x128xbf16>
    %c0_10 = arith.constant 0 : index
    %c0_11 = arith.constant 0 : index
    %14 = vector.load %arg5[%c0_10, %c0_11] : memref<128x128xbf16, #tpu.memory_space<vmem>>, vector<128x128xbf16>
    %cst_12 = arith.constant dense<0.000000e+00> : vector<16x128xf32>
    %15 = tpu.matmul %13, %14, %cst_12 {dimension_numbers = #tpu.dot_dimension_numbers<[1], [0], [0], [1], [0, 0, 1, 1], [], []>} : vector<16x128xbf16>, vector<128x128xbf16>, vector<16x128xf32> -> vector<16x128xf32>
    %16 = arith.addf %12, %15 : vector<16x128xf32>
    %c0_13 = arith.constant 0 : index
    %c0_14 = arith.constant 0 : index
    %17 = vector.load %arg7[%c0_13, %c0_14] : memref<16x128xf32, #tpu.memory_space<vmem>>, vector<16x128xf32>
    tpu.vector_store %arg7[%c0_13, %c0_14], %16 {strides = array<i32>} : memref<16x128xf32, #tpu.memory_space<vmem>>, vector<16x128xf32>,
    return
  }
  func.func @transform_0(%arg0: i32, %arg1: i32) -> (i32, i32) {
    %c0_i32 = arith.constant 0 : i32
    %c0_i32_0 = arith.constant 0 : i32
    return %arg0, %c0_i32 : i32, i32
  }
  func.func @transform_1(%arg0: i32, %arg1: i32) -> (i32, i32, i32) {
    %c0_i32 = arith.constant 0 : i32
    %c0_i32_0 = arith.constant 0 : i32
    %c0_i32_1 = arith.constant 0 : i32
    return %arg1, %c0_i32, %c0_i32_0 : i32, i32, i32
  }
  func.func @transform_2(%arg0: i32, %arg1: i32) -> (i32, i32) {
    %c0_i32 = arith.constant 0 : i32
    %c0_i32_0 = arith.constant 0 : i32
    return %c0_i32, %arg1 : i32, i32
  }
  func.func @transform_3(%arg0: i32, %arg1: i32) -> (i32, i32) {
    %c0_i32 = arith.constant 0 : i32
    %c0_i32_0 = arith.constant 0 : i32
    return %arg1, %c0_i32 : i32, i32
  }
  func.func @transform_4(%arg0: i32, %arg1: i32) -> (i32, i32) {
    %c0_i32 = arith.constant 0 : i32
    %c0_i32_0 = arith.constant 0 : i32
    %c0_i32_1 = arith.constant 0 : i32
    return %c0_i32, %c0_i32_0 : i32, i32
  }
  func.func @transform_5(%arg0: i32, %arg1: i32) -> (i32, i32) {
    %c0_i32 = arith.constant 0 : i32
    %c0_i32_0 = arith.constant 0 : i32
    return %arg0, %c0_i32 : i32, i32
  }
}

</mosaic_0001>

<bundles_post_ra>
// kernel: feed_forward.1
= control target key start
LH: loop header
LB: loop body
LE: loop exit
PB: predicated region body
PF: predicated region fallthrough
CT: control target
= control target key end

     0   :  { %v369_v0 = vmov 0.0   ;;  %vm370_vm0 = vmmov 0   ;;  %s464_s1 = inlined_call_operand.vmem [shape: bf16[1,128,128], index: 1, kind: input, shape index: {}]   ;;  %s465_s3 = inlined_call_operand.vmem [shape: bf16[128,128], index: 3, kind: input, shape index: {}]   ;;  %s466_s0 = inlined_call_operand.vmem [shape: bf16[16,128], index: 0, kind: input, shape index: {}]   ;;  %s467_s2 = inlined_call_operand.vmem [shape: f32[1,128], index: 2, kind: input, shape index: {}]   ;;  %s468_s4 = inlined_call_operand.vmem [shape: f32[1,128], index: 4, kind: input, shape index: {}]   ;;  %s469_s5 = inlined_call_operand.vmem [shape: f32[16,128], index: 5, kind: output, shape index: {}]  }
   0x1   :  { %310 = vmatprep.subr.bf16.mxu0 %v369_v0  ;;  %v352_v1 = vld [vmem:[%s464_s1 + $0x38] sm:$0xff]   ;;  %326 = vmatprep.mubr.msk.bf16.mxu0 %vm370_vm0, %v369_v0  ;;  %v353_v2 = vld [vmem:[%s464_s1 + $0x30] sm:$0xff]   ;;  %v354_v3 = vld [vmem:[%s464_s1 + $0x28] sm:$0xff]  }
   0x2   :  { %330 = vmatprep.subr.bf16.mxu1 %v369_v0  ;;  %346 = vmatprep.mubr.msk.bf16.mxu1 %vm370_vm0, %v369_v0  ;;  %v361_v4 = vld [vmem:[%s465_s3 + $0x38] sm:$0xff]   ;;  %v355_v5 = vld [vmem:[%s464_s1 + $0x20] sm:$0xff]   ;;  %v362_v6 = vld [vmem:[%s465_s3 + $0x30] sm:$0xff]  }
   0x3   :  { %311 = vmatpush3.bf16.msra.mxu0 %v352_v1  ;;  %331 = vmatpush3.bf16.msra.mxu1 %v361_v4  ;;  %v356_v7 = vld [vmem:[%s464_s1 + $0x18] sm:$0xff]   ;;  %v363_v8 = vld [vmem:[%s465_s3 + $0x28] sm:$0xff]   ;;  %v357_v9 = vld [vmem:[%s464_s1 + $0x10] sm:$0xff]  }
   0x4   :  { %312 = vmatprep.subr.bf16.mxu0 %v369_v0  ;;  %332 = vmatprep.subr.bf16.mxu1 %v369_v0  ;;  %v364_v10 = vld [vmem:[%s465_s3 + $0x20] sm:$0xff]   ;;  %v358_v11 = vld [vmem:[%s464_s1 + $0x8] sm:$0xff]   ;;  %v365_v12 = vld [vmem:[%s465_s3 + $0x18] sm:$0xff]  }
   0x5   :  { %v359_v13 = vld [vmem:[%s464_s1] sm:$0xff]   ;;  %v366_v15 = vld [vmem:[%s465_s3 + $0x10] sm:$0xff]   ;;  %v367_v16 = vld [vmem:[%s465_s3 + $0x8] sm:$0xff]  }
   0x6   :  { %v360_v14 = vld [vmem:[%s466_s0] sm:$0xff]  }
   0x7   :  { %313 = vmatpush3.bf16.msra.mxu0 %v353_v2  ;;  %333 = vmatpush3.bf16.msra.mxu1 %v362_v6  ;;  %v368_v17 = vld [vmem:[%s465_s3] sm:$0xff]  }
   0x8   :  { %314 = vmatprep.subr.bf16.mxu0 %v369_v0  ;;  %334 = vmatprep.subr.bf16.mxu1 %v369_v0  ;;  %v274_v18 = vld [vmem:[%s467_s2] ss:$0 sm:$0xff] }
   0x9   :  { %v273_v28 = vld [vmem:[%s468_s4] ss:$0 sm:$0xff] }
   0xb   :  { %315 = vmatpush3.bf16.msra.mxu0 %v354_v3  ;;  %335 = vmatpush3.bf16.msra.mxu1 %v363_v8 }
   0xc   :  { %316 = vmatprep.subr.bf16.mxu0 %v369_v0  ;;  %336 = vmatprep.subr.bf16.mxu1 %v369_v0 }
   0xf   :  { %317 = vmatpush3.bf16.msra.mxu0 %v355_v5  ;;  %337 = vmatpush3.bf16.msra.mxu1 %v364_v10 }
  0x10   :  { %318 = vmatprep.subr.bf16.mxu0 %v369_v0  ;;  %338 = vmatprep.subr.bf16.mxu1 %v369_v0 }
  0x13   :  { %319 = vmatpush3.bf16.msra.mxu0 %v356_v7  ;;  %339 = vmatpush3.bf16.msra.mxu1 %v365_v12 }
  0x14   :  { %320 = vmatprep.subr.bf16.mxu0 %v369_v0  ;;  %340 = vmatprep.subr.bf16.mxu1 %v369_v0 }
  0x17   :  { %321 = vmatpush3.bf16.msra.mxu0 %v357_v9  ;;  %341 = vmatpush3.bf16.msra.mxu1 %v366_v15 }
  0x18   :  { %322 = vmatprep.subr.bf16.mxu0 %v369_v0  ;;  %342 = vmatprep.subr.bf16.mxu1 %v369_v0 }
  0x1b   :  { %323 = vmatpush3.bf16.msra.mxu0 %v358_v11  ;;  %343 = vmatpush3.bf16.msra.mxu1 %v367_v16 }
  0x1c   :  { %324 = vmatprep.subr.bf16.mxu0 %v369_v0  ;;  %344 = vmatprep.subr.bf16.mxu1 %v369_v0 }
  0x1f   :  { %325 = vmatpush3.bf16.msra.mxu0 %v359_v13  ;;  %345 = vmatpush3.bf16.msra.mxu1 %v368_v17 }
  0x22   :  { %327 = vmatmul.mubr.bf16.vlgmr.msra.gmra.mxu0 %v360_v14 }
  0xe2   :  { %v148_v19 = vpop.f32.mrf.mxu0 }
  0xe3   :  { %v149_v21 = vadd.f32 %v274_v18, %v148_v19 }
  0xe4   :  { %v328_v20 = vpop.f32.mrf.mxu0 }
  0xe5   :  { %v155_v25 = vmax.f32 %v149_v21, 0.0 }
  0xe6   :  { %v151_v22 = vpop.f32.mrf.mxu0 }
  0xe7   :  { %v152_v23 = vadd.f32 %v274_v18, %v151_v22 }
  0xe8   :  { %v329_v24 = vpop.f32.mrf.mxu0 }
  0xe9   :  { %v156_v26 = vmax.f32 %v152_v23, 0.0 }
  0xeb   :  { %v159_v27 = vpack.c.bf16 %v156_v26, %v155_v25 }
  0xed   :  { %347 = vmatmul.mubr.bf16.vlgmr.msra.gmra.mxu1 %v159_v27 }
 0x1ad   :  { %v258_v29 = vpop.f32.mrf.mxu1 }
 0x1ae   :  { %v265_v30 = vadd.f32 %v273_v28, %v258_v29 }
 0x1af   :  { %v348_v31 = vpop.f32.mrf.mxu1 }
 0x1b0   :  { %267 = vst [vmem:[%s469_s5] sm:$0xff] %v265_v30 }
 0x1b1   :  { %v261_v32 = vpop.f32.mrf.mxu1 }
 0x1b2   :  { %v266_v33 = vadd.f32 %v273_v28, %v261_v32 }
 0x1b3   :  { %v349_v34 = vpop.f32.mrf.mxu1 }
 0x1b4   :  { %268 = vst [vmem:[%s469_s5 + $0x8] sm:$0xff] %v266_v33 }

</bundles_post_ra>
